<compile_context>
chip_gen: v6e
topology: v6e:2x2x1
jax: 0.10.0
libtpu: 0.0.40
codegen_flags: <defaults>
</compile_context>

<pallas_src>
import functools

import jax
import jax.numpy as jnp
from jax.experimental import pallas as pl
from jax.experimental.pallas import tpu as pltpu


def _identity_gather_kernel(seq_length, emb_ref, out_ref, sem):
    # Single direct HBM->HBM DMA of the first `seq_length` rows of the
    # embedding table into the output buffer.  Pure memory movement: this is
    # the HBM roofline for the op (read + write of seq_length * d elements).
    cp = pltpu.make_async_copy(
        emb_ref.at[pl.ds(0, seq_length), :], out_ref, sem)
    cp.start()
    cp.wait()


def _pallas_gather_rows(emb_table, seq_length):
    max_pos, d = emb_table.shape
    assert seq_length <= max_pos, "seq_length exceeds max_position_embeddings"
    return pl.pallas_call(
        functools.partial(_identity_gather_kernel, seq_length),
        out_shape=jax.ShapeDtypeStruct((seq_length, d), emb_table.dtype),
        # No auto-pipelining / VMEM staging: keep both operands where they
        # are and let one DMA do the copy.
        in_specs=[pl.BlockSpec(memory_space=pl.ANY)],
        out_specs=pl.BlockSpec(memory_space=pl.ANY),
        scratch_shapes=[pltpu.SemaphoreType.DMA(())],
    )(emb_table)


def learning_position_embedding(x, emb_table, seq_length, width,
                                force_pallas=False):
    """Pallas/JAX equivalent of LearningPositionEmbedding.forward.

    `x` is unused (the PyTorch module only reads x.device)."""
    del x
    max_pos, d = emb_table.shape
    assert d == width * width, "embedding dim must equal width*width"
    assert seq_length <= max_pos, "seq_length exceeds max_position_embeddings"

    if seq_length == max_pos and not force_pallas:
        # The module sets seq_length = max_position_embeddings, so positions
        # == arange(max_pos) and the whole forward is a pure view.
        return emb_table.reshape(1, seq_length, width, width)

    gathered = _pallas_gather_rows(emb_table, seq_length)
    # 4-D view done in the wrapper; kernel output stays a flat (seq, d) slab.
    return gathered.reshape(1, seq_length, width, width)


if __name__ == "__main__":
    key = jax.random.PRNGKey(0)
    k_x, k_emb, k_emb2 = jax.random.split(key, 3)

    max_position_embeddings = 8   # seq_length (module sets them equal)
    width = 16                    # embedding dim = width*width = 256
    d = width * width

    # Deterministic "parameter" init: nn.Embedding default is N(0, 1).
    emb_table = jax.random.normal(
        k_emb, (max_position_embeddings, d), dtype=jnp.float32)

    # x only matters for device placement in the PyTorch module.
    x = jax.random.normal(k_x, (2, 4, 16, 16), dtype=jnp.float32)

    # Pure-JAX reference of the PyTorch forward.
    ref = emb_table.reshape(1, max_position_embeddings, width, width)

    # 1) Module-faithful path (seq_length == max_pos): pure view, no kernel.
    out_view = learning_position_embedding(
        x, emb_table, max_position_embeddings, width)
    out_view = jax.block_until_ready(out_view)
    assert out_view.shape == (1, max_position_embeddings, width, width)
    assert out_view.dtype == jnp.float32
    assert jnp.allclose(out_view, ref), "view path mismatch vs reference"

    # 2) Exercise the Pallas DMA kernel on the same shapes.
    out_pallas = learning_position_embedding(
        x, emb_table, max_position_embeddings, width, force_pallas=True)
    out_pallas = jax.block_until_ready(out_pallas)
    assert out_pallas.shape == (1, max_position_embeddings, width, width)
    assert jnp.allclose(out_pallas, ref), "pallas path mismatch vs reference"

    # 3) Genuine sub-slice (seq_length < max_pos) -> kernel path by default.
    big_table = jax.random.normal(k_emb2, (16, d), dtype=jnp.float32)
    seq = 8
    out_slice = learning_position_embedding(x, big_table, seq, width)
    out_slice = jax.block_until_ready(out_slice)
    ref_slice = big_table[:seq].reshape(1, seq, width, width)
    assert jnp.allclose(out_slice, ref_slice), "slice path mismatch"

    print("KERNEL_OK")
</pallas_src>

<mosaic_0001>
module attributes {stable_mosaic.version = 11 : i64} {
  func.func @_identity_gather_kernel(%arg0: memref<8x256xf32, #tpu.memory_space<any>>, %arg1: memref<8x256xf32, #tpu.memory_space<any>>, %arg2: memref<!tpu.dma_semaphore, #tpu.memory_space<semaphore_mem>>) attributes {dimension_semantics = [], scalar_prefetch = 0 : i64, scratch_operands = 1 : i64, tpu.core_type = #tpu.core_type<tc>} {
    %c0_i32 = arith.constant 0 : i32
    %c0_i32_0 = arith.constant 0 : i32
    %0 = tpu.memref_slice %arg0[%c0_i32, %c0_i32_0] : memref<8x256xf32, #tpu.memory_space<any>> -> memref<8x256xf32, #tpu.memory_space<any>>
    tpu.enqueue_dma source(%0 : memref<8x256xf32, #tpu.memory_space<any>>) target(%arg1 : memref<8x256xf32, #tpu.memory_space<any>>) target_semaphore(%arg2 : memref<!tpu.dma_semaphore, #tpu.memory_space<semaphore_mem>>)
    %c0_i32_1 = arith.constant 0 : i32
    %c0_i32_2 = arith.constant 0 : i32
    %1 = tpu.memref_slice %arg0[%c0_i32_1, %c0_i32_2] : memref<8x256xf32, #tpu.memory_space<any>> -> memref<8x256xf32, #tpu.memory_space<any>>
    tpu.wait_dma2 semaphore(%arg2 : memref<!tpu.dma_semaphore, #tpu.memory_space<semaphore_mem>>) src(%1 : memref<8x256xf32, #tpu.memory_space<any>>) dst(%arg1 : memref<8x256xf32, #tpu.memory_space<any>>)
    return
  }
}

</mosaic_0001>

<bundles_post_ra>
// kernel: tpu_custom_call.1
= control target key start
LH: loop header
LB: loop body
LE: loop exit
PB: predicated region body
PF: predicated region fallthrough
CT: control target
= control target key end

     0   :  { %s29_s6 = smov [#allocation2]   ;;  %s30_s7 = smov 131072   ;;  %s48_s0 = inlined_call_operand.hbm [shape: f32[8,256], index: 0, kind: input, shape index: {}]   ;;  %s49_s1 = inlined_call_operand.hbm [shape: f32[8,256], index: 1, kind: output, shape index: {}]  }
   0x1   :  { %s31_s8 = smov 0  }
   0x2   :  { %12 = dma.general %s48_s0, 256, %s49_s1, %s29_s6, %s30_s7, [#allocation4], %s31_s8, 0  }
   0x3   :  { %27 = dma.done.wait [#allocation2], 256 }
   0x4   :  { %28 = vsyncadd [#allocation2], 4294967040 }
   0x5   :  { %17 = vsyncmov [#allocation2] }
   0x8   :  { %s18_s13 = vpop.sfrf %17 }
   0x9   :  { %p23_p0 = scmp.ne.s32.totalorder %s18_s13, 0 }
   0xb   :  { %22 = shalt.err (%p23_p0)  }

</bundles_post_ra>
